<compile_context>
chip_gen: v7x
topology: tpu7x:2x2x1
jax: 0.10.0
libtpu: 0.0.40
codegen_flags: <defaults>
</compile_context>

<pallas_src>
import jax
import jax.numpy as jnp
from jax.experimental import pallas as pl
from jax.experimental.pallas import tpu as pltpu

_LANES = 128
_ROW_GRAN = 32                 # sublane granularity safe for f32 / bf16 blocks
_DEFAULT_ROWS_PER_STEP = 2048  # 2048 x 128 f32 = 2 MiB input tile per grid step


def _round_up(n, m):
    return -(-n // m) * m


def _pick_rows_per_step(R, requested):
    """Rows of 128 samples processed per grid step (multiple of _ROW_GRAN,
    or the full extent R when a single step suffices)."""
    rt = _round_up(max(1, requested), _ROW_GRAN)
    rt = min(rt, _round_up(R, _ROW_GRAN))
    if rt >= R:
        return R               # single step; block spans the full row extent
    return rt


def mlp_kernel(x_ref, w1_ref, b1_ref, w2_ref, b2_ref, o_ref):
    # x_ref : (2, rt, 128) VMEM -- feature-major, batch dense over sublanes*lanes
    # w1_ref: (4,) SMEM = W1.reshape(-1) = [W1[0,0], W1[0,1], W1[1,0], W1[1,1]]
    # b1_ref: (2,) SMEM
    # w2_ref: (2,) SMEM = [W2[0,0], W2[0,1]]
    # b2_ref: (1,) SMEM
    # o_ref : (rt, 128) VMEM
    # Hoist every scalar read once per grid step (no re-splat per use chain).
    w1_00 = w1_ref[0]
    w1_01 = w1_ref[1]
    w1_10 = w1_ref[2]
    w1_11 = w1_ref[3]
    b1_0 = b1_ref[0]
    b1_1 = b1_ref[1]
    w2_0 = w2_ref[0]
    w2_1 = w2_ref[1]
    b2_0 = b2_ref[0]

    x0 = x_ref[0].astype(jnp.float32)        # (rt, 128)
    x1 = x_ref[1].astype(jnp.float32)        # (rt, 128)

    # Linear(2, 2) + ReLU: pure VPU multiply-adds.
    h0 = jnp.maximum(x0 * w1_00 + x1 * w1_01 + b1_0, 0.0)
    h1 = jnp.maximum(x0 * w1_10 + x1 * w1_11 + b1_1, 0.0)

    # Linear(2, 1).
    o_ref[...] = (h0 * w2_0 + h1 * w2_1 + b2_0).astype(o_ref.dtype)


def simple_net_forward_dense(x_dense, w1, b1, w2, b2, *,
                             rows_per_step=_DEFAULT_ROWS_PER_STEP):
    """Lane-dense fast path.

    x_dense: (2, R, 128) float32/bfloat16, feature-major: x_dense[f, r, l] is
    feature f of sample r*128 + l.  Returns the dense (R, 128) float32 output
    (keep it in this layout if it feeds further TPU compute).
    """
    nf, R, L = x_dense.shape
    assert nf == 2 and L == _LANES, "x_dense must have shape (2, R, 128)"

    rt = _pick_rows_per_step(R, rows_per_step)
    grid = (pl.cdiv(R, rt),)

    # Torch-style parameters, flattened to tiny 1-D SMEM-resident arrays.
    w1f = jnp.asarray(w1, jnp.float32).reshape(4)
    b1f = jnp.asarray(b1, jnp.float32).reshape(2)
    w2f = jnp.asarray(w2, jnp.float32).reshape(2)
    b2f = jnp.asarray(b2, jnp.float32).reshape(1)

    smem = pl.BlockSpec(memory_space=pltpu.MemorySpace.SMEM)

    n = R * _LANES
    bytes_accessed = (x_dense.size * x_dense.dtype.itemsize  # activations in
                      + n * 4                                # output out
                      + 9 * 4)                               # parameters
    cost = pl.CostEstimate(flops=13 * n, transcendentals=0,
                           bytes_accessed=bytes_accessed)

    return pl.pallas_call(
        mlp_kernel,
        out_shape=jax.ShapeDtypeStruct((R, _LANES), jnp.float32),
        grid=grid,
        in_specs=[
            pl.BlockSpec((2, rt, _LANES), lambda i: (0, i, 0)),  # x tile, pipelined
            smem,   # w1 (resident scalars)
            smem,   # b1
            smem,   # w2
            smem,   # b2
        ],
        out_specs=pl.BlockSpec((rt, _LANES), lambda i: (i, 0)),
        compiler_params=pltpu.CompilerParams(
            dimension_semantics=("parallel",)),
        cost_estimate=cost,
    )(x_dense, w1f, b1f, w2f, b2f)


def simple_net_forward(x, w1, b1, w2, b2, *,
                       rows_per_step=_DEFAULT_ROWS_PER_STEP):
    """Torch-style adapter.  x: (B, 2); w1: (2, 2) (out, in); b1: (2,);
    w2: (1, 2); b2: (1,).  Returns (B, 1) float32.

    A (B, 2) f32 array is lane-padded on TPU, so this adapter performs one
    relayout (transpose + zero-pad + reshape) into the dense (2, R, 128) form.
    Producers that can emit that layout directly should call
    simple_net_forward_dense() and skip this step entirely.
    """
    B = x.shape[0]
    R = pl.cdiv(B, _LANES)
    rt = _pick_rows_per_step(R, rows_per_step)
    R_pad = _round_up(R, rt)

    x_t = jnp.asarray(x).T                       # (2, B); layout plumbing only
    pad = R_pad * _LANES - B
    if pad:
        # Padded samples produce bias-propagated garbage; sliced off below.
        x_t = jnp.pad(x_t, ((0, 0), (0, pad)))
    x_dense = x_t.reshape(2, R_pad, _LANES)

    y_dense = simple_net_forward_dense(x_dense, w1, b1, w2, b2,
                                       rows_per_step=rt)
    # Final (B, 1) materialization only for torch-shape parity; prefer keeping
    # y_dense if the result feeds further TPU compute.
    return y_dense.reshape(-1)[:B].reshape(B, 1)


if __name__ == "__main__":
    key = jax.random.PRNGKey(0)
    kx, kw1, kb1, kw2, kb2 = jax.random.split(key, 5)

    # torch.nn.Linear shapes: Linear(2,2): weight (2,2), bias (2,);
    #                         Linear(2,1): weight (1,2), bias (1,)
    w1 = jax.random.normal(kw1, (2, 2), dtype=jnp.float32) * 0.5
    b1 = jax.random.normal(kb1, (2,), dtype=jnp.float32) * 0.1
    w2 = jax.random.normal(kw2, (1, 2), dtype=jnp.float32) * 0.5
    b2 = jax.random.normal(kb2, (1,), dtype=jnp.float32) * 0.1

    def ref_fwd(xv):
        xv = xv.astype(jnp.float32)
        h = jnp.maximum(jnp.dot(xv, w1.T, precision="highest") + b1, 0.0)
        return jnp.dot(h, w2.T, precision="highest") + b2

    # Small batch: exercises lane padding + tail slicing (single grid step).
    B_small = 8
    x_small = jax.random.normal(kx, (B_small, 2), dtype=jnp.float32)
    out_small = jax.block_until_ready(simple_net_forward(x_small, w1, b1, w2, b2))
    assert out_small.shape == (B_small, 1)
    assert jnp.allclose(out_small, ref_fwd(x_small), atol=1e-5, rtol=1e-5)

    # Batch not a multiple of 128: exercises zero-padding correctness.
    B_mid = 300
    x_mid = jax.random.normal(kx, (B_mid, 2), dtype=jnp.float32)
    out_mid = jax.block_until_ready(simple_net_forward(x_mid, w1, b1, w2, b2))
    assert out_mid.shape == (B_mid, 1)
    assert jnp.allclose(out_mid, ref_fwd(x_mid), atol=1e-5, rtol=1e-5)

    # bf16 activations: cast to f32 inside the kernel, arithmetic stays f32.
    x_bf16 = x_mid.astype(jnp.bfloat16)
    out_bf16 = jax.block_until_ready(simple_net_forward(x_bf16, w1, b1, w2, b2))
    assert jnp.allclose(out_bf16, ref_fwd(x_bf16.astype(jnp.float32)),
                        atol=1e-5, rtol=1e-5)

    # Multi-step pipelined grid (small rows_per_step keeps the demo tiny):
    # B = 128*96 -> R = 96 rows -> 3 grid steps at 32 rows/step.
    B_big = 128 * 96
    x_big = jax.random.normal(kx, (B_big, 2), dtype=jnp.float32)
    out_big = jax.block_until_ready(
        simple_net_forward(x_big, w1, b1, w2, b2, rows_per_step=32))
    assert out_big.shape == (B_big, 1)
    assert jnp.allclose(out_big, ref_fwd(x_big), atol=1e-5, rtol=1e-5)

    print("KERNEL_OK")
</pallas_src>

<mosaic_0001>
module attributes {stable_mosaic.version = 11 : i64} {
  func.func @mlp_kernel(%arg0: i32, %arg1: memref<2x1x128xf32, #tpu.memory_space<vmem>>, %arg2: memref<4xf32, #tpu.memory_space<smem>>, %arg3: memref<2xf32, #tpu.memory_space<smem>>, %arg4: memref<2xf32, #tpu.memory_space<smem>>, %arg5: memref<1xf32, #tpu.memory_space<smem>>, %arg6: memref<1x128xf32, #tpu.memory_space<vmem>>) attributes {dimension_semantics = [#tpu.dimension_semantics<parallel>], iteration_bounds = array<i64: 1>, scalar_prefetch = 0 : i64, scratch_operands = 0 : i64, tpu.core_type = #tpu.core_type<tc>, window_params = [{transform_indices = @transform_0, window_bounds = array<i64: 2, 1, 128>}, {transform_indices = @transform_1, window_bounds = array<i64: 4>}, {transform_indices = @transform_2, window_bounds = array<i64: 2>}, {transform_indices = @transform_3, window_bounds = array<i64: 2>}, {transform_indices = @transform_4, window_bounds = array<i64: 1>}, {transform_indices = @transform_5, window_bounds = array<i64: 1, 128>}]} {
    %c0 = arith.constant 0 : index
    %0 = memref.load %arg2[%c0] : memref<4xf32, #tpu.memory_space<smem>>
    %c1 = arith.constant 1 : index
    %1 = memref.load %arg2[%c1] : memref<4xf32, #tpu.memory_space<smem>>
    %c2 = arith.constant 2 : index
    %2 = memref.load %arg2[%c2] : memref<4xf32, #tpu.memory_space<smem>>
    %c3 = arith.constant 3 : index
    %3 = memref.load %arg2[%c3] : memref<4xf32, #tpu.memory_space<smem>>
    %c0_0 = arith.constant 0 : index
    %4 = memref.load %arg3[%c0_0] : memref<2xf32, #tpu.memory_space<smem>>
    %c1_1 = arith.constant 1 : index
    %5 = memref.load %arg3[%c1_1] : memref<2xf32, #tpu.memory_space<smem>>
    %c0_2 = arith.constant 0 : index
    %6 = memref.load %arg4[%c0_2] : memref<2xf32, #tpu.memory_space<smem>>
    %c1_3 = arith.constant 1 : index
    %7 = memref.load %arg4[%c1_3] : memref<2xf32, #tpu.memory_space<smem>>
    %c0_4 = arith.constant 0 : index
    %8 = memref.load %arg5[%c0_4] : memref<1xf32, #tpu.memory_space<smem>>
    %c0_5 = arith.constant 0 : index
    %c0_6 = arith.constant 0 : index
    %c0_7 = arith.constant 0 : index
    %9 = vector.load %arg1[%c0_5, %c0_6, %c0_7] : memref<2x1x128xf32, #tpu.memory_space<vmem>>, vector<1x1x128xf32>
    %10 = vector.shape_cast %9 : vector<1x1x128xf32> to vector<1x128xf32>
    %c1_8 = arith.constant 1 : index
    %c0_9 = arith.constant 0 : index
    %c0_10 = arith.constant 0 : index
    %11 = vector.load %arg1[%c1_8, %c0_9, %c0_10] : memref<2x1x128xf32, #tpu.memory_space<vmem>>, vector<1x1x128xf32>
    %12 = vector.shape_cast %11 : vector<1x1x128xf32> to vector<1x128xf32>
    %13 = vector.broadcast %0 : f32 to vector<1x128xf32>
    %14 = arith.mulf %10, %13 : vector<1x128xf32>
    %15 = vector.broadcast %1 : f32 to vector<1x128xf32>
    %16 = arith.mulf %12, %15 : vector<1x128xf32>
    %17 = arith.addf %14, %16 : vector<1x128xf32>
    %18 = vector.broadcast %4 : f32 to vector<1x128xf32>
    %19 = arith.addf %17, %18 : vector<1x128xf32>
    %cst = arith.constant 0.000000e+00 : f32
    %20 = vector.broadcast %cst : f32 to vector<1x128xf32>
    %21 = arith.maximumf %19, %20 : vector<1x128xf32>
    %22 = vector.broadcast %2 : f32 to vector<1x128xf32>
    %23 = arith.mulf %10, %22 : vector<1x128xf32>
    %24 = vector.broadcast %3 : f32 to vector<1x128xf32>
    %25 = arith.mulf %12, %24 : vector<1x128xf32>
    %26 = arith.addf %23, %25 : vector<1x128xf32>
    %27 = vector.broadcast %5 : f32 to vector<1x128xf32>
    %28 = arith.addf %26, %27 : vector<1x128xf32>
    %cst_11 = arith.constant 0.000000e+00 : f32
    %29 = vector.broadcast %cst_11 : f32 to vector<1x128xf32>
    %30 = arith.maximumf %28, %29 : vector<1x128xf32>
    %31 = vector.broadcast %6 : f32 to vector<1x128xf32>
    %32 = arith.mulf %21, %31 : vector<1x128xf32>
    %33 = vector.broadcast %7 : f32 to vector<1x128xf32>
    %34 = arith.mulf %30, %33 : vector<1x128xf32>
    %35 = arith.addf %32, %34 : vector<1x128xf32>
    %36 = vector.broadcast %8 : f32 to vector<1x128xf32>
    %37 = arith.addf %35, %36 : vector<1x128xf32>
    %c0_12 = arith.constant 0 : index
    %c0_13 = arith.constant 0 : index
    %38 = vector.load %arg6[%c0_12, %c0_13] : memref<1x128xf32, #tpu.memory_space<vmem>>, vector<1x128xf32>
    tpu.vector_store %arg6[%c0_12, %c0_13], %37 {strides = array<i32>} : memref<1x128xf32, #tpu.memory_space<vmem>>, vector<1x128xf32>,
    return
  }
  func.func @transform_0(%arg0: i32) -> (i32, i32, i32) {
    %c0_i32 = arith.constant 0 : i32
    %c0_i32_0 = arith.constant 0 : i32
    %c0_i32_1 = arith.constant 0 : i32
    return %c0_i32, %arg0, %c0_i32_0 : i32, i32, i32
  }
  func.func @transform_1(%arg0: i32) -> i32 {
    %c0_i32 = arith.constant 0 : i32
    %c0_i32_0 = arith.constant 0 : i32
    return %c0_i32 : i32
  }
  func.func @transform_2(%arg0: i32) -> i32 {
    %c0_i32 = arith.constant 0 : i32
    %c0_i32_0 = arith.constant 0 : i32
    return %c0_i32 : i32
  }
  func.func @transform_3(%arg0: i32) -> i32 {
    %c0_i32 = arith.constant 0 : i32
    %c0_i32_0 = arith.constant 0 : i32
    return %c0_i32 : i32
  }
  func.func @transform_4(%arg0: i32) -> i32 {
    %c0_i32 = arith.constant 0 : i32
    %c0_i32_0 = arith.constant 0 : i32
    return %c0_i32 : i32
  }
  func.func @transform_5(%arg0: i32) -> (i32, i32) {
    %c0_i32 = arith.constant 0 : i32
    %c0_i32_0 = arith.constant 0 : i32
    return %arg0, %c0_i32 : i32, i32
  }
}

</mosaic_0001>

<bundles_post_ra>
// kernel: tpu_custom_call.1
= control target key start
LH: loop header
LB: loop body
LE: loop exit
PB: predicated region body
PF: predicated region fallthrough
CT: control target
= control target key end

     0   :  { %11 = vsyncpa [#allocation5], 0  ;;  %s248_s0 = inlined_call_operand.vmem [shape: f32[2,1,128], index: 0, kind: input, shape index: {}]   ;;  %s249_s1 = inlined_call_operand.vmem [shape: f32[4], index: 1, kind: input, shape index: {}]   ;;  %s250_s2 = inlined_call_operand.vmem [shape: f32[2], index: 2, kind: input, shape index: {}]   ;;  %s251_s3 = inlined_call_operand.vmem [shape: f32[2], index: 3, kind: input, shape index: {}]   ;;  %s252_s4 = inlined_call_operand.<no memory space> [shape: f32[1], index: 4, kind: input, shape index: {}]   ;;  %s253_s5 = inlined_call_operand.hbm [shape: f32[1,128], index: 5, kind: output, shape index: {}]  }
   0x1   :  { %12 = vsyncpa [#allocation7], 0  ;;  %s32_s20 = sshll.u32 %s250_s2, 4  ;;  %s33_s20 = int_to_ptr.vmem [resolvable:$true] %s32_s20 }
   0x2   :  { %13 = vsyncpa [#allocation4], 0  ;;  %s22_s23 = sshll.u32 %s249_s1, 4  ;;  %s120_s24 = scalar_lea.vmem %s33_s20, 16  ;;  %s23_s23 = int_to_ptr.vmem [resolvable:$true] %s22_s23 }
   0x3   :  { %p121_p0 = scmp.ne.s32.totalorder %s33_s20, %s120_s24  ;;  %p125_p1 = scmp.lt.s32.totalorder %s33_s20, %s33_s20 }
   0x4   :  { %p126_p2 = scmp.lt.s32.totalorder %s120_s24, %s120_s24 }
   0x6   :  { %p127_p3 = por %p126_p2, %p125_p1 }
   0x8   :  { %p128_p4 = pnand %p127_p3, %p121_p0 }
   0xa   :  { %131 = shalt.err (!%p128_p4)
}
   0xb   :  { %s184_s25 = smov [#allocation6]   ;;  %s132_s26 = scalar_lea.vmem %s23_s23, 16 }
   0xc   :  { %35 = dma.vmem_to_smem %s33_s20, 16, %s184_s25, [#allocation7]  }
   0xd   :  { %p133_p5 = scmp.ne.s32.totalorder %s23_s23, %s132_s26  ;;  %p137_p6 = scmp.lt.s32.totalorder %s23_s23, %s23_s23 }
   0xe   :  { %p138_p7 = scmp.lt.s32.totalorder %s132_s26, %s132_s26 }
  0x10   :  { %p139_p8 = por %p138_p7, %p137_p6 }
  0x12   :  { %p140_p9 = pnand %p139_p8, %p133_p5 }
  0x14   :  { %143 = shalt.err (!%p140_p9)
}
  0x15   :  { %s185_s2 = smov [#allocation3]   ;;  %s42_s28 = sshll.u32 %s251_s3, 4  ;;  %s43_s28 = int_to_ptr.vmem [resolvable:$true] %s42_s28 }
  0x16   :  { %25 = dma.vmem_to_smem %s23_s23, 16, %s185_s2, [#allocation5]  }
  0x17   :  { %s144_s29 = scalar_lea.vmem %s43_s28, 16  ;;  %p149_p11 = scmp.lt.s32.totalorder %s43_s28, %s43_s28 }
  0x18   :  { %p145_p10 = scmp.ne.s32.totalorder %s43_s28, %s144_s29  ;;  %p150_p12 = scmp.lt.s32.totalorder %s144_s29, %s144_s29 }
  0x1a   :  { %p151_p13 = por %p150_p12, %p149_p11 }
  0x1c   :  { %p152_p0 = pnand %p151_p13, %p145_p10 }
  0x1e   :  { %155 = shalt.err (!%p152_p0)
}
  0x1f   :  { %s186_s30 = smov [#allocation8]  }
  0x20   :  { %45 = dma.vmem_to_smem %s43_s28, 16, %s186_s30, [#allocation7]  }
  0x21   :  { %178 = dma.done.wait [#allocation5], 16  }
  0x22   :  { %179 = vsyncadd [#allocation5], 4294967280 }
  0x23   :  { %180 = dma.done.wait [#allocation7], 32  }
  0x24   :  { %181 = vsyncadd [#allocation7], 4294967264 }
  0x25   :  { %57 = sfence }
  0x26   :  { %s58_s6 = sld [smem:[#allocation3]]  ;;  %s110_s7 = sld [smem:[#allocation3 + $0x1]]  ;;  %v67_v0 = vld [vmem:[%s248_s0] sm:$0x1]  ;;  %v115_v1 = vld [vmem:[%s248_s0 + $0x1] sm:$0x1]  ;;  %v91_v22 = vstv %s252_s4 }
  0x27   :  { %s111_s8 = sld [smem:[#allocation3 + $0x2]]  ;;  %s112_s9 = sld [smem:[#allocation3 + $0x3]] }
  0x28   :  { %s62_s3 = sld [smem:[#allocation6]]  ;;  %s113_s10 = sld [smem:[#allocation6 + $0x1]] }
  0x29   :  { %s64_s11 = sld [smem:[#allocation8]]  ;;  %s114_s16 = sld [smem:[#allocation8 + $0x1]] }
  0x2a   :  { %s187_s18 = smov [#allocation9]  }
  0x2b   :  { %s100_s19 = sshll.u32 %s187_s18, 4  ;;  %s101_s19 = int_to_ptr.vmem [resolvable:$true] %s100_s19 }
  0x2c   :  { %v70_v2 = vstv %s58_s6  ;;  %v72_v3 = vstv %s110_s7  ;;  %s156_s20 = scalar_lea.vmem %s101_s19, 16  ;;  %s160_s21 = scalar_lea.vmem %s101_s19, 32 }
  0x2d   :  { %v71_v4 = vmul.f32 %v70_v2, %v67_v0  ;;  %v73_v5 = vmul.f32 %v115_v1, %v72_v3  ;;  %v78_v6 = vstv %s111_s8  ;;  %v80_v7 = vstv %s112_s9  ;;  %p157_p1 = scmp.ne.s32.totalorder %s101_s19, %s156_s20  ;;  %p161_p2 = scmp.lt.s32.totalorder %s101_s19, %s101_s19 }
  0x2e   :  { %v75_v8 = vstv %s62_s3  ;;  %v79_v9 = vmul.f32 %v78_v6, %v67_v0  ;;  %v81_v10 = vmul.f32 %v115_v1, %v80_v7  ;;  %v83_v12 = vstv %s113_s10  ;;  %p162_p3 = scmp.lt.s32.totalorder %s160_s21, %s156_s20 }
  0x2f   :  { %v74_v11 = vadd.f32 %v73_v5, %v71_v4  ;;  %v86_v16 = vstv %s64_s11  ;;  %v88_v18 = vstv %s114_s16 }
  0x30   :  { %v82_v13 = vadd.f32 %v81_v10, %v79_v9  ;;  %p163_p4 = por %p162_p3, %p161_p2 }
  0x31   :  { %v76_v14 = vadd.f32 %v75_v8, %v74_v11 }
  0x32   :  { %v84_v15 = vadd.f32 %v83_v12, %v82_v13  ;;  %p164_p5 = pnand %p163_p4, %p157_p1 }
  0x33   :  { %v77_v17 = vmax.f32 %v76_v14, 0.0 }
  0x34   :  { %v85_v19 = vmax.f32 %v84_v15, 0.0 }
  0x35   :  { %v87_v20 = vmul.f32 %v86_v16, %v77_v17 }
  0x36   :  { %v89_v21 = vmul.f32 %v88_v18, %v85_v19 }
  0x38   :  { %v90_v23 = vadd.f32 %v89_v21, %v87_v20 }
  0x3a   :  { %v92_v24 = vadd.f32 %v91_v22, %v90_v23 }
  0x3c   :  { %93 = vst [vmem:[#allocation9] sm:$0x1] %v92_v24 }
  0x3d   :  { %167 = shalt.err (!%p164_p5)
}
  0x3e   :  { %s168_s24 = scalar_lea.hbm %s253_s5, 16 }
  0x3f   :  { %p169_p6 = scmp.ne.s32.totalorder %s253_s5, %s168_s24  ;;  %p172_p7 = scmp.lt.u32.totalorder %s168_s24, %s253_s5 }
  0x41   :  { %p174_p8 = pnand %p172_p7, %p169_p6 }
  0x43   :  { %177 = shalt.err (!%p174_p8)
}
  0x44   :  { %103 = dma.vmem_to_hbm [thread:$0]  %s101_s19, 16, %s253_s5, [#allocation4]  }
  0x45   :  { %182 = dma.done.wait [#allocation4], 16  }
  0x46   :  { %183 = vsyncadd [#allocation4], 4294967280 }
  0x47   :  { %107 = vsyncpa [#allocation4], 1 }
  0x48   :  { %108 = vsyncpa [#allocation5], 1 }
  0x49   :  { %109 = vsyncpa [#allocation7], 1 }

</bundles_post_ra>
